<compile_context>
chip_gen: v6e
topology: v6e:2x2x1
jax: 0.10.0
libtpu: 0.0.40
codegen_flags: <defaults>
</compile_context>

<pallas_src>
import functools

import jax
import jax.numpy as jnp
from jax import lax
from jax.experimental import pallas as pl
from jax.experimental.pallas import tpu as pltpu


TEMPERATURE = 0.1
NEG_INF = -1.0e9
EPS = 1e-6
LANE = 128


def _round_up(n, m):
    return ((n + m - 1) // m) * m


def _cdiv(a, b):
    return -(-a // b)


def _vector_memory_kernel(x_ref, wk_ref, bk_ref, mkT_ref, mask_ref, neg_ref,
                          mvwo_ref, bo_ref, out_ref, *, precision):
    """One row-tile of the VectorMemoryStore forward.

    x_ref    : (TM, Hp)  input rows (hidden dim zero-padded to lane width)
    wk_ref   : (Hp, K)   key projection weight (zero rows in the pad)
    bk_ref   : (1, K)    key projection bias
    mkT_ref  : (K, M)    normalize(memory_keys).T / temperature
    mask_ref : (1, M)    (usage > 0) as 0/1
    neg_ref  : (1, M)    -1e9 * (1 - mask)
    mvwo_ref : (M, Hp)   memory_values @ Wo (zero cols in the pad)
    bo_ref   : (1, Hp)   output bias (zero cols in the pad)
    out_ref  : (TM, Hp)
    """
    x = x_ref[...]

    # --- key projection: q = x @ Wk + bk (f32 accumulation) ----------------
    q = jnp.dot(x, wk_ref[...], preferred_element_type=jnp.float32,
                precision=precision) + bk_ref[...]

    # --- scores.  Memory keys are pre-normalized / pre-transposed /
    #     pre-scaled by 1/T in the wrapper; the query-normalization scale
    #     (module convention rsqrt(sum_sq + 1e-6)) is applied AFTER the
    #     matmul so the MXU push starts as soon as q is ready. --------------
    inv_qnorm = lax.rsqrt(jnp.sum(q * q, axis=-1, keepdims=True) + EPS)
    raw = jnp.dot(q.astype(mkT_ref.dtype), mkT_ref[...],
                  preferred_element_type=jnp.float32, precision=precision)
    scores = raw * inv_qnorm

    # --- usage mask, exactly like the module: s*mask + (-1e9)*(1-mask) -----
    masked = scores * mask_ref[...] + neg_ref[...]

    # --- softmax over the memory axis (EXACT divide; the approximate EUP
    #     reciprocal caused the 1.4e-3 mismatch in the previous revision) ---
    m = jnp.max(masked, axis=-1, keepdims=True)
    e = jnp.exp(masked - m)
    attn = e / jnp.sum(e, axis=-1, keepdims=True)

    # --- fused retrieval + output projection: attn @ (mv @ Wo) + bo --------
    out = jnp.dot(attn.astype(mvwo_ref.dtype), mvwo_ref[...],
                  preferred_element_type=jnp.float32,
                  precision=precision) + bo_ref[...]
    out_ref[...] = out.astype(out_ref.dtype)


def vector_memory_forward(hidden_states, params, *, compute_dtype=jnp.float32,
                          max_row_tile=512):
    """hidden_states: [B, S, H] -> output [B, S, H] float32."""
    B, S, H = hidden_states.shape
    N = B * S

    f32 = jnp.float32
    x = hidden_states.reshape(N, H).astype(f32)
    wk = params["wk"].astype(f32)              # (H, K)
    bk = params["bk"].astype(f32)              # (1, K)
    mk = params["memory_keys"].astype(f32)     # (M, K)
    mv = params["memory_values"].astype(f32)   # (M, V)
    usage = params["memory_usage"].astype(f32)  # (1, M)
    wo = params["wo"].astype(f32)              # (V, H)
    bo = params["bo"].astype(f32)              # (1, H)

    K = wk.shape[1]
    M = mv.shape[0]

    # f32 path stays f32-faithful on the MXU; bf16 path uses native bf16.
    precision = (lax.Precision.HIGHEST
                 if jnp.dtype(compute_dtype) == jnp.float32
                 else lax.Precision.DEFAULT)

    # ---- one-time grid-invariant precomputes -------------------------------
    mk_n = mk * lax.rsqrt(jnp.sum(mk * mk, axis=-1, keepdims=True) + EPS)
    mk_n_scaled_T = (mk_n / TEMPERATURE).T                        # (K, M)
    mv_wo = jnp.dot(mv, wo, precision=lax.Precision.HIGHEST)      # (M, H)
    usage_mask = (usage > 0.0).astype(f32)                        # (1, M)
    usage_neg = NEG_INF * (1.0 - usage_mask)                      # (1, M)

    # ---- lane-dense feature dim: zero-pad H up to a multiple of 128 --------
    Hp = _round_up(H, LANE)
    if Hp != H:
        wk = jnp.pad(wk, ((0, Hp - H), (0, 0)))
        mv_wo = jnp.pad(mv_wo, ((0, 0), (0, Hp - H)))
        bo = jnp.pad(bo, ((0, 0), (0, Hp - H)))

    # ---- balanced row tiling; >= 2 parallel grid steps once there is enough
    #      work so both v7x TensorCores are used -----------------------------
    min_tiles = 2 if N >= 256 else 1
    n_tiles = max(_cdiv(N, max_row_tile), min_tiles)
    row_tile = _round_up(_cdiv(N, n_tiles), 8)
    n_pad = _round_up(N, row_tile)
    if (n_pad, Hp) != (N, H):
        x = jnp.pad(x, ((0, n_pad - N), (0, Hp - H)))
    grid = (n_pad // row_tile,)

    # ---- MXU operand dtypes (optional bf16; accumulation stays f32) --------
    x = x.astype(compute_dtype)
    wk = wk.astype(compute_dtype)
    mk_n_scaled_T = mk_n_scaled_T.astype(compute_dtype)
    mv_wo = mv_wo.astype(compute_dtype)

    kernel = functools.partial(_vector_memory_kernel, precision=precision)

    # NOTE(v7x VMEM): the weight blocks below are grid-invariant and tiny at
    # these sizes; if M/H ever scale up, single-buffer them
    # (pipeline_mode=pl.Buffered(1)) or tile M as a trailing reduction axis.
    out = pl.pallas_call(
        kernel,
        out_shape=jax.ShapeDtypeStruct((n_pad, Hp), jnp.float32),
        grid_spec=pl.GridSpec(
            grid=grid,
            in_specs=[
                pl.BlockSpec((row_tile, Hp), lambda i: (i, 0)),  # x rows
                pl.BlockSpec((Hp, K),        lambda i: (0, 0)),  # Wk
                pl.BlockSpec((1, K),         lambda i: (0, 0)),  # bk
                pl.BlockSpec((K, M),         lambda i: (0, 0)),  # keys.T / T
                pl.BlockSpec((1, M),         lambda i: (0, 0)),  # usage mask
                pl.BlockSpec((1, M),         lambda i: (0, 0)),  # -1e9*(1-mask)
                pl.BlockSpec((M, Hp),        lambda i: (0, 0)),  # mv @ Wo
                pl.BlockSpec((1, Hp),        lambda i: (0, 0)),  # bo
            ],
            out_specs=pl.BlockSpec((row_tile, Hp), lambda i: (i, 0)),
        ),
        compiler_params=pltpu.CompilerParams(
            dimension_semantics=("parallel",)),
    )(x, wk, bk, mk_n_scaled_T, usage_mask, usage_neg, mv_wo, bo)

    return out[:N, :H].reshape(B, S, H)


def _reference_forward(hidden_states, params):
    """Pure-JAX mirror of the PyTorch forward (the in-place memory update is
    excluded — it rewrites buffers but does not change the returned tensor)."""
    hp = lax.Precision.HIGHEST
    x = hidden_states.astype(jnp.float32)
    q = jnp.dot(x, params["wk"], precision=hp) + params["bk"][0]
    q_n = q * lax.rsqrt(jnp.sum(q * q, axis=-1, keepdims=True) + EPS)
    mk = params["memory_keys"]
    mk_n = mk * lax.rsqrt(jnp.sum(mk * mk, axis=-1, keepdims=True) + EPS)
    scores = jnp.dot(q_n, mk_n.T, precision=hp) / TEMPERATURE
    mask = (params["memory_usage"][0] > 0.0).astype(jnp.float32)[None, None, :]
    masked = scores * mask + NEG_INF * (1.0 - mask)
    attn = jax.nn.softmax(masked, axis=-1)
    retrieved = jnp.dot(attn, params["memory_values"], precision=hp)
    return jnp.dot(retrieved, params["wo"], precision=hp) + params["bo"][0]


if __name__ == "__main__":
    # Small shapes consistent with the module's forward:
    #   hidden_size=32, key_size=value_size=32, memory_size=128, B=2, S=8
    B, S, H = 2, 8, 32
    K = V = 32
    M = 128

    key = jax.random.PRNGKey(0)
    k_x, k_wk, k_bk, k_mk, k_mv, k_wo, k_bo, k_use = jax.random.split(key, 8)

    hidden_states = jax.random.normal(k_x, (B, S, H), dtype=jnp.float32)

    # Deterministic synthetic parameter / buffer init (no checkpoint load).
    params = {
        "wk": jax.random.normal(k_wk, (H, K), dtype=jnp.float32) * 0.1,
        "bk": jax.random.normal(k_bk, (1, K), dtype=jnp.float32) * 0.01,
        "wo": jax.random.normal(k_wo, (V, H), dtype=jnp.float32) * 0.1,
        "bo": jax.random.normal(k_bo, (1, H), dtype=jnp.float32) * 0.01,
        # Memory buffers: half the slots "active" (usage > 0), rest empty.
        "memory_keys": jax.random.normal(k_mk, (M, K), dtype=jnp.float32),
        "memory_values": jax.random.normal(k_mv, (M, V), dtype=jnp.float32),
        "memory_usage": jnp.where(
            jnp.arange(M)[None, :] < M // 2, 1.0, 0.0).astype(jnp.float32),
    }

    ref = _reference_forward(hidden_states, params)

    # f32 path: must match the module's f32 math tightly.
    out = vector_memory_forward(hidden_states, params)
    out = jax.block_until_ready(out)
    assert out.shape == (B, S, H)
    err = float(jnp.max(jnp.abs(out - ref)))
    assert jnp.allclose(out, ref, atol=2e-4, rtol=2e-4), err

    # bf16-MXU-operand path (perf feedback): loose consistency check only,
    # since operand rounding to bf16 intentionally trades accuracy for speed.
    out_bf16 = vector_memory_forward(hidden_states, params,
                                     compute_dtype=jnp.bfloat16)
    out_bf16 = jax.block_until_ready(out_bf16)
    err_bf16 = float(jnp.max(jnp.abs(out_bf16 - ref)))
    assert jnp.allclose(out_bf16, ref, atol=1e-1, rtol=1e-1), err_bf16

    print("KERNEL_OK")
</pallas_src>

<mosaic_0001>
module attributes {stable_mosaic.version = 11 : i64} {
  func.func @_vector_memory_kernel(%arg0: i32, %arg1: memref<16x128xf32, #tpu.memory_space<vmem>>, %arg2: memref<128x32xf32, #tpu.memory_space<vmem>>, %arg3: memref<1x32xf32, #tpu.memory_space<vmem>>, %arg4: memref<32x128xf32, #tpu.memory_space<vmem>>, %arg5: memref<1x128xf32, #tpu.memory_space<vmem>>, %arg6: memref<1x128xf32, #tpu.memory_space<vmem>>, %arg7: memref<128x128xf32, #tpu.memory_space<vmem>>, %arg8: memref<1x128xf32, #tpu.memory_space<vmem>>, %arg9: memref<16x128xf32, #tpu.memory_space<vmem>>) attributes {dimension_semantics = [#tpu.dimension_semantics<parallel>], iteration_bounds = array<i64: 1>, scalar_prefetch = 0 : i64, scratch_operands = 0 : i64, tpu.core_type = #tpu.core_type<tc>, window_params = [{transform_indices = @transform_0, window_bounds = array<i64: 16, 128>}, {pipeline_mode = #tpu.pipeline_mode<synchronous>, transform_indices = @transform_1, window_bounds = array<i64: 128, 32>}, {pipeline_mode = #tpu.pipeline_mode<synchronous>, transform_indices = @transform_2, window_bounds = array<i64: 1, 32>}, {pipeline_mode = #tpu.pipeline_mode<synchronous>, transform_indices = @transform_3, window_bounds = array<i64: 32, 128>}, {pipeline_mode = #tpu.pipeline_mode<synchronous>, transform_indices = @transform_4, window_bounds = array<i64: 1, 128>}, {pipeline_mode = #tpu.pipeline_mode<synchronous>, transform_indices = @transform_5, window_bounds = array<i64: 1, 128>}, {pipeline_mode = #tpu.pipeline_mode<synchronous>, transform_indices = @transform_6, window_bounds = array<i64: 128, 128>}, {pipeline_mode = #tpu.pipeline_mode<synchronous>, transform_indices = @transform_7, window_bounds = array<i64: 1, 128>}, {transform_indices = @transform_8, window_bounds = array<i64: 16, 128>}]} {
    %c0 = arith.constant 0 : index
    %c0_0 = arith.constant 0 : index
    %0 = vector.load %arg1[%c0, %c0_0] : memref<16x128xf32, #tpu.memory_space<vmem>>, vector<16x128xf32>
    %c0_1 = arith.constant 0 : index
    %c0_2 = arith.constant 0 : index
    %1 = vector.load %arg2[%c0_1, %c0_2] : memref<128x32xf32, #tpu.memory_space<vmem>>, vector<128x32xf32>
    %cst = arith.constant dense<0.000000e+00> : vector<16x32xf32>
    %2 = tpu.matmul %0, %1, %cst {dimension_numbers = #tpu.dot_dimension_numbers<[1], [0], [0], [1], [0, 0, 1, 1], [], []>, precision = #tpu.contract_precision<fp32>} : vector<16x128xf32>, vector<128x32xf32>, vector<16x32xf32> -> vector<16x32xf32>
    %c0_3 = arith.constant 0 : index
    %c0_4 = arith.constant 0 : index
    %3 = vector.load %arg3[%c0_3, %c0_4] : memref<1x32xf32, #tpu.memory_space<vmem>>, vector<1x32xf32>
    %4 = vector.broadcast %3 : vector<1x32xf32> to vector<16x32xf32>
    %5 = arith.addf %2, %4 : vector<16x32xf32>
    %6 = arith.mulf %5, %5 : vector<16x32xf32>
    %cst_5 = arith.constant dense<0.000000e+00> : vector<16xf32>
    %7 = vector.multi_reduction <add>, %6, %cst_5 [1] : vector<16x32xf32> to vector<16xf32>
    %8 = vector.shape_cast %7 : vector<16xf32> to vector<16x1xf32>
    %cst_6 = arith.constant 9.99999997E-7 : f32
    %9 = vector.broadcast %cst_6 : f32 to vector<16x1xf32>
    %10 = arith.addf %8, %9 : vector<16x1xf32>
    %11 = math.rsqrt %10 : vector<16x1xf32>
    %c0_7 = arith.constant 0 : index
    %c0_8 = arith.constant 0 : index
    %12 = vector.load %arg4[%c0_7, %c0_8] : memref<32x128xf32, #tpu.memory_space<vmem>>, vector<32x128xf32>
    %cst_9 = arith.constant dense<0.000000e+00> : vector<16x128xf32>
    %13 = tpu.matmul %5, %12, %cst_9 {dimension_numbers = #tpu.dot_dimension_numbers<[1], [0], [0], [1], [0, 0, 1, 1], [], []>, precision = #tpu.contract_precision<fp32>} : vector<16x32xf32>, vector<32x128xf32>, vector<16x128xf32> -> vector<16x128xf32>
    %14 = vector.broadcast %11 : vector<16x1xf32> to vector<16x128xf32>
    %15 = arith.mulf %13, %14 : vector<16x128xf32>
    %c0_10 = arith.constant 0 : index
    %c0_11 = arith.constant 0 : index
    %16 = vector.load %arg5[%c0_10, %c0_11] : memref<1x128xf32, #tpu.memory_space<vmem>>, vector<1x128xf32>
    %17 = vector.broadcast %16 : vector<1x128xf32> to vector<16x128xf32>
    %18 = arith.mulf %15, %17 : vector<16x128xf32>
    %c0_12 = arith.constant 0 : index
    %c0_13 = arith.constant 0 : index
    %19 = vector.load %arg6[%c0_12, %c0_13] : memref<1x128xf32, #tpu.memory_space<vmem>>, vector<1x128xf32>
    %20 = vector.broadcast %19 : vector<1x128xf32> to vector<16x128xf32>
    %21 = arith.addf %18, %20 : vector<16x128xf32>
    %cst_14 = arith.constant dense<0xFF800000> : vector<16xf32>
    %22 = vector.multi_reduction <maximumf>, %21, %cst_14 [1] : vector<16x128xf32> to vector<16xf32>
    %23 = vector.shape_cast %22 : vector<16xf32> to vector<16x1xf32>
    %24 = vector.broadcast %23 : vector<16x1xf32> to vector<16x128xf32>
    %25 = arith.subf %21, %24 : vector<16x128xf32>
    %26 = math.exp %25 : vector<16x128xf32>
    %cst_15 = arith.constant dense<0.000000e+00> : vector<16xf32>
    %27 = vector.multi_reduction <add>, %26, %cst_15 [1] : vector<16x128xf32> to vector<16xf32>
    %28 = vector.shape_cast %27 : vector<16xf32> to vector<16x1xf32>
    %29 = vector.broadcast %28 : vector<16x1xf32> to vector<16x128xf32>
    %30 = arith.divf %26, %29 : vector<16x128xf32>
    %c0_16 = arith.constant 0 : index
    %c0_17 = arith.constant 0 : index
    %31 = vector.load %arg7[%c0_16, %c0_17] : memref<128x128xf32, #tpu.memory_space<vmem>>, vector<128x128xf32>
    %cst_18 = arith.constant dense<0.000000e+00> : vector<16x128xf32>
    %32 = tpu.matmul %30, %31, %cst_18 {dimension_numbers = #tpu.dot_dimension_numbers<[1], [0], [0], [1], [0, 0, 1, 1], [], []>, precision = #tpu.contract_precision<fp32>} : vector<16x128xf32>, vector<128x128xf32>, vector<16x128xf32> -> vector<16x128xf32>
    %c0_19 = arith.constant 0 : index
    %c0_20 = arith.constant 0 : index
    %33 = vector.load %arg8[%c0_19, %c0_20] : memref<1x128xf32, #tpu.memory_space<vmem>>, vector<1x128xf32>
    %34 = vector.broadcast %33 : vector<1x128xf32> to vector<16x128xf32>
    %35 = arith.addf %32, %34 : vector<16x128xf32>
    %c0_21 = arith.constant 0 : index
    %c0_22 = arith.constant 0 : index
    %36 = vector.load %arg9[%c0_21, %c0_22] : memref<16x128xf32, #tpu.memory_space<vmem>>, vector<16x128xf32>
    tpu.vector_store %arg9[%c0_21, %c0_22], %35 {strides = array<i32>} : memref<16x128xf32, #tpu.memory_space<vmem>>, vector<16x128xf32>,
    return
  }
  func.func @transform_0(%arg0: i32) -> (i32, i32) {
    %c0_i32 = arith.constant 0 : i32
    %c0_i32_0 = arith.constant 0 : i32
    return %arg0, %c0_i32 : i32, i32
  }
  func.func @transform_1(%arg0: i32) -> (i32, i32) {
    %c0_i32 = arith.constant 0 : i32
    %c0_i32_0 = arith.constant 0 : i32
    %c0_i32_1 = arith.constant 0 : i32
    return %c0_i32, %c0_i32_0 : i32, i32
  }
  func.func @transform_2(%arg0: i32) -> (i32, i32) {
    %c0_i32 = arith.constant 0 : i32
    %c0_i32_0 = arith.constant 0 : i32
    %c0_i32_1 = arith.constant 0 : i32
    return %c0_i32, %c0_i32_0 : i32, i32
  }
  func.func @transform_3(%arg0: i32) -> (i32, i32) {
    %c0_i32 = arith.constant 0 : i32
    %c0_i32_0 = arith.constant 0 : i32
    %c0_i32_1 = arith.constant 0 : i32
    return %c0_i32, %c0_i32_0 : i32, i32
  }
  func.func @transform_4(%arg0: i32) -> (i32, i32) {
    %c0_i32 = arith.constant 0 : i32
    %c0_i32_0 = arith.constant 0 : i32
    %c0_i32_1 = arith.constant 0 : i32
    return %c0_i32, %c0_i32_0 : i32, i32
  }
  func.func @transform_5(%arg0: i32) -> (i32, i32) {
    %c0_i32 = arith.constant 0 : i32
    %c0_i32_0 = arith.constant 0 : i32
    %c0_i32_1 = arith.constant 0 : i32
    return %c0_i32, %c0_i32_0 : i32, i32
  }
  func.func @transform_6(%arg0: i32) -> (i32, i32) {
    %c0_i32 = arith.constant 0 : i32
    %c0_i32_0 = arith.constant 0 : i32
    %c0_i32_1 = arith.constant 0 : i32
    return %c0_i32, %c0_i32_0 : i32, i32
  }
  func.func @transform_7(%arg0: i32) -> (i32, i32) {
    %c0_i32 = arith.constant 0 : i32
    %c0_i32_0 = arith.constant 0 : i32
    %c0_i32_1 = arith.constant 0 : i32
    return %c0_i32, %c0_i32_0 : i32, i32
  }
  func.func @transform_8(%arg0: i32) -> (i32, i32) {
    %c0_i32 = arith.constant 0 : i32
    %c0_i32_0 = arith.constant 0 : i32
    return %arg0, %c0_i32 : i32, i32
  }
}

</mosaic_0001>

<bundles_post_ra>
// kernel: tpu_custom_call.1
= control target key start
LH: loop header
LB: loop body
LE: loop exit
PB: predicated region body
PF: predicated region fallthrough
CT: control target
= control target key end

     0   :  { %13 = vsyncpa [#allocation3], 0  ;;  %s3838_s0 = inlined_call_operand.hbm [shape: f32[16,128], index: 0, kind: input, shape index: {}]   ;;  %s3839_s1 = inlined_call_operand.vmem [shape: f32[128,32], index: 1, kind: input, shape index: {}]   ;;  %s3840_s2 = inlined_call_operand.vmem [shape: f32[1,32], index: 2, kind: input, shape index: {}]   ;;  %s3841_s3 = inlined_call_operand.vmem [shape: f32[32,128], index: 3, kind: input, shape index: {}]   ;;  %s3842_s4 = inlined_call_operand.vmem [shape: f32[1,128], index: 4, kind: input, shape index: {}]   ;;  %s3843_s5 = inlined_call_operand.vmem [shape: f32[1,128], index: 5, kind: input, shape index: {}]   ;;  %s3844_s6 = inlined_call_operand.vmem [shape: f32[128,128], index: 6, kind: input, shape index: {}]   ;;  %s3845_s7 = inlined_call_operand.vmem [shape: f32[1,128], index: 7, kind: input, shape index: {}]   ;;  %s3846_s8 = inlined_call_operand.hbm [shape: f32[16,128], index: 8, kind: output, shape index: {}]  }
   0x1   :  { %14 = vsyncpa [#allocation4], 0  ;;  %s2870_s27 = smov [#allocation2]  }
   0x2   :  { %s20_s28 = sshll.u32 %s2870_s27, 4  ;;  %s21_s28 = int_to_ptr.vmem [resolvable:$true] %s20_s28 }
   0x3   :  { %s2834_s29 = scalar_lea.vmem %s21_s28, 256  ;;  %p2839_p1 = scmp.lt.s32.totalorder %s21_s28, %s21_s28 }
   0x4   :  { %p2835_p0 = scmp.ne.s32.totalorder %s21_s28, %s2834_s29  ;;  %p2840_p2 = scmp.lt.s32.totalorder %s2834_s29, %s2834_s29 }
   0x6   :  { %p2841_p3 = por %p2840_p2, %p2839_p1 }
   0x8   :  { %p2842_p4 = pnand %p2841_p3, %p2835_p0 }
   0xa   :  { %2845 = shalt.err (!%p2842_p4)
}
   0xb   :  { %s2871_s30 = smov 128   ;;  %s2872_s9 = smov 8  }
   0xc   :  { %26 = dma.hbm_to_vmem [thread:$0]  %s3838_s0, 256, %s21_s28, [#allocation3], %s2871_s30, %s2871_s30, %s2872_s9  }
   0xd   :  { %2866 = dma.done.wait [#allocation3], 256  }
   0xe   :  { %2867 = vsyncadd [#allocation3], 4294967040  ;;  %v61_v0 = vld [vmem:[%s3839_s1 + $0x78] sm:$0xff]  ;;  %v60_v1 = vld [vmem:[%s3839_s1 + $0x70] sm:$0xff]  ;;  %vm755_vm0 = vcmask 261120  }
   0xf   :  { %v59_v2 = vld [vmem:[%s3839_s1 + $0x68] sm:$0xff]  ;;  %v2934_v3 = vand.u32 4294901760, %v61_v0  ;;  %v2936_v4 = vand.u32 4294901760, %v60_v1  ;;  %v58_v6 = vld [vmem:[%s3839_s1 + $0x60] sm:$0xff]  ;;  %v57_v7 = vld [vmem:[%s3839_s1 + $0x58] sm:$0xff] }
  0x10   :  { %v2938_v5 = vand.u32 4294901760, %v59_v2  ;;  %v56_v8 = vld [vmem:[%s3839_s1 + $0x50] sm:$0xff]  ;;  %v2949_v9 = vand.u32 4294901760, %v58_v6  ;;  %v2951_v10 = vand.u32 4294901760, %v57_v7  ;;  %v55_v12 = vld [vmem:[%s3839_s1 + $0x48] sm:$0xff]  ;;  %v54_v13 = vld [vmem:[%s3839_s1 + $0x40] sm:$0xff] }
  0x11   :  { %v2953_v11 = vand.u32 4294901760, %v56_v8  ;;  %2324 = vmatprep.subr.mxu0 %v2934_v3  ;;  %v2963_v14 = vsub.f32 %v61_v0, %v2934_v3  ;;  %v2966_v15 = vsub.f32 %v60_v1, %v2936_v4  ;;  %v2968_v16 = vand.u32 4294901760, %v55_v12  ;;  %v53_v18 = vld [vmem:[%s3839_s1 + $0x38] sm:$0xff]  ;;  %v52_v25 = vld [vmem:[%s3839_s1 + $0x30] sm:$0xff]  ;;  %v51_v35 = vld [vmem:[%s3839_s1 + $0x28] sm:$0xff] }
  0x12   :  { %v2971_v17 = vsub.f32 %v59_v2, %v2938_v5  ;;  %2325 = vmatpush3.msra.mxu0 %v2934_v3  ;;  %v2978_v19 = vsub.f32 %v58_v6, %v2949_v9  ;;  %v2981_v20 = vsub.f32 %v57_v7, %v2951_v10  ;;  %v2993_v24 = vand.u32 4294901760, %v54_v13  ;;  %v50_v40 = vld [vmem:[%s3839_s1 + $0x20] sm:$0xff]  ;;  %v49_v48 = vld [vmem:[%s3839_s1 + $0x18] sm:$0xff]  ;;  %v45_v54 = vld [vmem:[#allocation2 + $0x8] sm:$0xff] }
  0x13   :  { %2326 = vmatprep.subr.mxu0 %v2936_v4  ;;  %v2985_v21 = vand.u32 4294901760, %v2963_v14  ;;  %v2988_v22 = vand.u32 4294901760, %v2966_v15  ;;  %v3002_v27 = vand.u32 4294901760, %v53_v18  ;;  %v3008_v29 = vsub.f32 %v56_v8, %v2953_v11  ;;  %v44_v49 = vld [vmem:[#allocation2] sm:$0xff]  ;;  %v48_v59 = vld [vmem:[%s3839_s1 + $0x10] sm:$0xff]  ;;  %v47_v2 = vld [vmem:[%s3839_s1 + $0x8] sm:$0xff] }
  0x14   :  { %v2991_v23 = vand.u32 4294901760, %v2971_v17  ;;  %2327 = vmatpush3.msra.mxu0 %v2936_v4  ;;  %v3000_v26 = vand.u32 4294901760, %v2978_v19  ;;  %v3005_v28 = vand.u32 4294901760, %v2981_v20  ;;  %v3018_v33 = vsub.f32 %v55_v12, %v2968_v16 }
  0x15   :  { %2328 = vmatprep.subr.mxu0 %v2938_v5  ;;  %v174_v30 = vsub.f32 %v2963_v14, %v2985_v21  ;;  %v181_v31 = vsub.f32 %v2966_v15, %v2988_v22  ;;  %v3021_v34 = vand.u32 4294901760, %v52_v25  ;;  %v3030_v39 = vand.u32 4294901760, %v3008_v29 }
  0x16   :  { %v188_v32 = vsub.f32 %v2971_v17, %v2991_v23  ;;  %2329 = vmatpush3.msra.mxu0 %v2938_v5  ;;  %v195_v38 = vsub.f32 %v2978_v19, %v3000_v26  ;;  %v202_v41 = vsub.f32 %v2981_v20, %v3005_v28  ;;  %v3039_v42 = vand.u32 4294901760, %v3018_v33 }
  0x17   :  { %2330 = vmatprep.subr.mxu0 %v2949_v9  ;;  %v175_v36 = vand.u32 4294901760, %v174_v30  ;;  %v182_v37 = vand.u32 4294901760, %v181_v31  ;;  %v3042_v43 = vsub.f32 %v54_v13, %v2993_v24  ;;  %v3045_v45 = vand.u32 4294901760, %v51_v35 }
  0x18   :  { %2331 = vmatpush3.msra.mxu0 %v2949_v9  ;;  %v189_v44 = vand.u32 4294901760, %v188_v32  ;;  %v3048_v46 = vsub.f32 %v53_v18, %v3002_v27  ;;  %v3051_v47 = vand.u32 4294901760, %v50_v40  ;;  %v196_v50 = vand.u32 4294901760, %v195_v38  ;;  %v46_v18 = vld [vmem:[%s3839_s1] sm:$0xff] }
  0x19   :  { %2332 = vmatprep.subr.mxu0 %v2951_v10  ;;  %2359 = vmatprep.subr.mxu1 %v175_v36  ;;  %v209_v51 = vsub.f32 %v3008_v29, %v3030_v39  ;;  %v3060_v52 = vand.u32 4294901760, %v3042_v43  ;;  %v3063_v53 = vsub.f32 %v52_v25, %v3021_v34  ;;  %v203_v55 = vand.u32 4294901760, %v202_v41 }
  0x1a   :  { %2333 = vmatpush3.msra.mxu0 %v2951_v10  ;;  %2360 = vmatpush3.msra.mxu1 %v175_v36  ;;  %v216_v56 = vsub.f32 %v3018_v33, %v3039_v42  ;;  %v3069_v57 = vand.u32 4294901760, %v49_v48  ;;  %v3072_v58 = vand.u32 4294901760, %v3048_v46  ;;  %v3078_v60 = vsub.f32 %v51_v35, %v3045_v45 }
  0x1b   :  { %2334 = vmatprep.subr.mxu0 %v2953_v11  ;;  %2361 = vmatprep.subr.mxu1 %v182_v37  ;;  %v3080_v61 = vand.u32 4294901760, %v44_v49  ;;  %v3083_v62 = vand.u32 4294901760, %v45_v54  ;;  %v210_v63 = vand.u32 4294901760, %v209_v51  ;;  %v223_v0 = vsub.f32 %v3042_v43, %v3060_v52 }
  0x1c   :  { %2335 = vmatpush3.msra.mxu0 %v2953_v11  ;;  %2362 = vmatpush3.msra.mxu1 %v182_v37  ;;  %v3089_v1 = vand.u32 4294901760, %v3063_v53  ;;  %v3095_v6 = vsub.f32 %v50_v40, %v3051_v47  ;;  %v217_v7 = vand.u32 4294901760, %v216_v56  ;;  %v3098_v8 = vand.u32 4294901760, %v48_v59 }
  0x1d   :  { %2336 = vmatprep.subr.mxu0 %v2968_v16  ;;  %2363 = vmatprep.subr.mxu1 %v189_v44  ;;  %v230_v12 = vsub.f32 %v3048_v46, %v3072_v58  ;;  %v3104_v13 = vand.u32 4294901760, %v3078_v60  ;;  %v3110_v25 = vsub.f32 %v44_v49, %v3080_v61  ;;  %v3113_v30 = vsub.f32 %v49_v48, %v3069_v57 }
  0x1e   :  { %2337 = vmatpush3.msra.mxu0 %v2968_v16  ;;  %2364 = vmatpush3.msra.mxu1 %v189_v44  ;;  %v3116_v31 = vand.u32 4294901760, %v47_v2  ;;  %v3119_v32 = vsub.f32 %v45_v54, %v3083_v62  ;;  %v224_v35 = vand.u32 4294901760, %v223_v0  ;;  %v237_v36 = vsub.f32 %v3063_v53, %v3089_v1 }
  0x1f   :  { %2338 = vmatprep.subr.mxu0 %v2993_v24  ;;  %2365 = vmatprep.subr.mxu1 %v196_v50  ;;  %v3125_v37 = vand.u32 4294901760, %v3095_v6  ;;  %v3128_v38 = vand.u32 4294901760, %v46_v18  ;;  %v3131_v40 = vsub.f32 %v48_v59, %v3098_v8  ;;  %v231_v41 = vand.u32 4294901760, %v230_v12 }
  0x20   :  { %2339 = vmatpush3.msra.mxu0 %v2993_v24  ;;  %2366 = vmatpush3.msra.mxu1 %v196_v50  ;;  %v244_v44 = vsub.f32 %v3078_v60, %v3104_v13  ;;  %v3848_v48 = vand.u32 4294901760, %v3110_v25  ;;  %v3138_v49 = vand.u32 4294901760, %v3113_v30  ;;  %v3847_v50 = vand.u32 4294901760, %v3119_v32 }
  0x21   :  { %2340 = vmatprep.subr.mxu0 %v3002_v27  ;;  %2367 = vmatprep.subr.mxu1 %v203_v55  ;;  %v3143_v51 = vsub.f32 %v47_v2, %v3116_v31  ;;  %v238_v54 = vand.u32 4294901760, %v237_v36  ;;  %v3150_v56 = vand.u32 4294901760, %v3131_v40  ;;  %v3153_v59 = vsub.f32 %v46_v18, %v3128_v38 }
  0x22   :  { %2341 = vmatpush3.msra.mxu0 %v3002_v27  ;;  %2368 = vmatpush3.msra.mxu1 %v203_v55  ;;  %v251_v55 = vsub.f32 %v3095_v6, %v3125_v37  ;;  %v153_v0 = vsub.f32 %v3110_v25, %v3848_v48  ;;  %v258_v2 = vsub.f32 %v3113_v30, %v3138_v49 }
  0x23   :  { %2342 = vmatprep.subr.mxu0 %v3021_v34  ;;  %2369 = vmatprep.subr.mxu1 %v210_v63  ;;  %v3166_v12 = vand.u32 4294901760, %v3143_v51  ;;  %v3173_v36 = vand.u32 4294901760, %v3153_v59 }
  0x24   :  { %2343 = vmatpush3.msra.mxu0 %v3021_v34  ;;  %2370 = vmatpush3.msra.mxu1 %v210_v63  ;;  %v245_v63 = vand.u32 4294901760, %v244_v44  ;;  %v252_v18 = vand.u32 4294901760, %v251_v55  ;;  %v259_v44 = vand.u32 4294901760, %v258_v2 }
  0x25   :  { %2344 = vmatprep.subr.mxu0 %v3045_v45  ;;  %2371 = vmatprep.subr.mxu1 %v217_v7  ;;  %v272_v55 = vsub.f32 %v3143_v51, %v3166_v12  ;;  %v279_v48 = vsub.f32 %v3153_v59, %v3173_v36 }
  0x26   :  { %2345 = vmatpush3.msra.mxu0 %v3045_v45  ;;  %2372 = vmatpush3.msra.mxu1 %v217_v7  ;;  %v163_v7 = vsub.f32 %v3119_v32, %v3847_v50 }
  0x27   :  { %2346 = vmatprep.subr.mxu0 %v3051_v47  ;;  %2373 = vmatprep.subr.mxu1 %v224_v35 }
  0x28   :  { %2347 = vmatpush3.msra.mxu0 %v3051_v47  ;;  %2374 = vmatpush3.msra.mxu1 %v224_v35  ;;  %v265_v35 = vsub.f32 %v3131_v40, %v3150_v56  ;;  %v164_v50 = vand.u32 4294901760, %v163_v7 }
  0x29   :  { %2348 = vmatprep.subr.mxu0 %v3069_v57  ;;  %2375 = vmatprep.subr.mxu1 %v231_v41 }
  0x2a   :  { %2349 = vmatpush3.msra.mxu0 %v3069_v57  ;;  %2376 = vmatpush3.msra.mxu1 %v231_v41  ;;  %v154_v41 = vand.u32 4294901760, %v153_v0  ;;  %v280_v0 = vand.u32 4294901760, %v279_v48 }
  0x2b   :  { %2350 = vmatprep.subr.mxu0 %v3098_v8  ;;  %2377 = vmatprep.subr.mxu1 %v238_v54 }
  0x2c   :  { %2351 = vmatpush3.msra.mxu0 %v3098_v8  ;;  %2378 = vmatpush3.msra.mxu1 %v238_v54  ;;  %v266_v54 = vand.u32 4294901760, %v265_v35 }
  0x2d   :  { %2352 = vmatprep.subr.mxu0 %v3116_v31  ;;  %2379 = vmatprep.subr.mxu1 %v245_v63 }
  0x2e   :  { %2353 = vmatpush3.msra.mxu0 %v3116_v31  ;;  %2380 = vmatpush3.msra.mxu1 %v245_v63  ;;  %v273_v63 = vand.u32 4294901760, %v272_v55 }
  0x2f   :  { %2354 = vmatprep.subr.mxu0 %v3128_v38  ;;  %2381 = vmatprep.subr.mxu1 %v252_v18 }
  0x30   :  { %2355 = vmatpush3.msra.mxu0 %v3128_v38  ;;  %2382 = vmatpush3.msra.mxu1 %v252_v18 }
  0x31   :  { %2356 = vmatprep.mubr.f32.mxu0 %v154_v41  ;;  %2383 = vmatprep.subr.mxu1 %v259_v44 }
  0x32   :  { %2394 = vmatprep.subr.mxu0 %v2963_v14  ;;  %2357 = vmatmul.mubr.f32.vlgmr.msra.gmra.mxu0 %v164_v50 }
  0x33   :  { %2384 = vmatpush3.msra.mxu1 %v259_v44  ;;  %2395 = vmatpush3.msra.mxu0 %v2963_v14  ;;  %v3849_v14 = vand.u32 4294901760, %v3110_v25 }
  0x34   :  { %2385 = vmatprep.subr.mxu1 %v266_v54  ;;  %2396 = vmatprep.subr.mxu0 %v2966_v15 }
  0x35   :  { %2386 = vmatpush3.msra.mxu1 %v266_v54  ;;  %2397 = vmatpush3.msra.mxu0 %v2966_v15  ;;  %v3850_v15 = vand.u32 4294901760, %v3119_v32 }
  0x36   :  { %2387 = vmatprep.subr.mxu1 %v273_v63  ;;  %2398 = vmatprep.subr.mxu0 %v2971_v17 }
  0x37   :  { %2388 = vmatpush3.msra.mxu1 %v273_v63  ;;  %2399 = vmatpush3.msra.mxu0 %v2971_v17 }
  0x38   :  { %2389 = vmatprep.subr.mxu1 %v280_v0  ;;  %2400 = vmatprep.subr.mxu0 %v2978_v19 }
  0x39   :  { %2390 = vmatpush3.msra.mxu1 %v280_v0  ;;  %2391 = vmatprep.mubr.f32.mxu1 %v3080_v61 }
  0x3a   :  { %2401 = vmatpush3.msra.mxu0 %v2978_v19  ;;  %2392 = vmatmul.mubr.f32.vlgmr.msra.gmra.mxu1 %v3083_v62 }
  0x3b   :  { %2402 = vmatprep.subr.mxu0 %v2981_v20  ;;  %2429 = vmatprep.subr.mxu1 %v2934_v3 }
  0x3c   :  { %2403 = vmatpush3.msra.mxu0 %v2981_v20  ;;  %2430 = vmatpush3.msra.mxu1 %v2934_v3  ;;  %v766_v20 = vld [vmem:[%s3841_s3] sm:$0xff] }
  0x3d   :  { %2404 = vmatprep.subr.mxu0 %v3008_v29  ;;  %2431 = vmatprep.subr.mxu1 %v2936_v4 }
  0x3e   :  { %2405 = vmatpush3.msra.mxu0 %v3008_v29  ;;  %2432 = vmatpush3.msra.mxu1 %v2936_v4 }
  0x3f   :  { %2406 = vmatprep.subr.mxu0 %v3018_v33  ;;  %2433 = vmatprep.subr.mxu1 %v2938_v5 }
  0x40   :  { %2407 = vmatpush3.msra.mxu0 %v3018_v33  ;;  %2434 = vmatpush3.msra.mxu1 %v2938_v5 }
  0x41   :  { %2408 = vmatprep.subr.mxu0 %v3042_v43  ;;  %2435 = vmatprep.subr.mxu1 %v2949_v9 }
  0x42   :  { %2409 = vmatpush3.msra.mxu0 %v3042_v43  ;;  %2436 = vmatpush3.msra.mxu1 %v2949_v9 }
  0x43   :  { %2410 = vmatprep.subr.mxu0 %v3048_v46  ;;  %2437 = vmatprep.subr.mxu1 %v2951_v10 }
  0x44   :  { %2411 = vmatpush3.msra.mxu0 %v3048_v46  ;;  %2438 = vmatpush3.msra.mxu1 %v2951_v10 }
  0x45   :  { %2412 = vmatprep.subr.mxu0 %v3063_v53  ;;  %2439 = vmatprep.subr.mxu1 %v2953_v11 }
  0x46   :  { %2413 = vmatpush3.msra.mxu0 %v3063_v53  ;;  %2440 = vmatpush3.msra.mxu1 %v2953_v11 }
  0x47   :  { %2414 = vmatprep.subr.mxu0 %v3078_v60  ;;  %2441 = vmatprep.subr.mxu1 %v2968_v16 }
  0x48   :  { %2415 = vmatpush3.msra.mxu0 %v3078_v60  ;;  %2442 = vmatpush3.msra.mxu1 %v2968_v16 }
  0x49   :  { %2416 = vmatprep.subr.mxu0 %v3095_v6  ;;  %2443 = vmatprep.subr.mxu1 %v2993_v24 }
  0x4a   :  { %2417 = vmatpush3.msra.mxu0 %v3095_v6  ;;  %2444 = vmatpush3.msra.mxu1 %v2993_v24 }
  0x4b   :  { %2418 = vmatprep.subr.mxu0 %v3113_v30  ;;  %2445 = vmatprep.subr.mxu1 %v3002_v27 }
  0x4c   :  { %2419 = vmatpush3.msra.mxu0 %v3113_v30  ;;  %2446 = vmatpush3.msra.mxu1 %v3002_v27 }
  0x4d   :  { %2420 = vmatprep.subr.mxu0 %v3131_v40  ;;  %2447 = vmatprep.subr.mxu1 %v3021_v34 }
  0x4e   :  { %2421 = vmatpush3.msra.mxu0 %v3131_v40  ;;  %2448 = vmatpush3.msra.mxu1 %v3021_v34 }
  0x4f   :  { %2422 = vmatprep.subr.mxu0 %v3143_v51  ;;  %2449 = vmatprep.subr.mxu1 %v3045_v45 }
  0x50   :  { %2423 = vmatpush3.msra.mxu0 %v3143_v51  ;;  %2450 = vmatpush3.msra.mxu1 %v3045_v45 }
  0x51   :  { %2424 = vmatprep.subr.mxu0 %v3153_v59  ;;  %2451 = vmatprep.subr.mxu1 %v3051_v47 }
  0x52   :  { %2425 = vmatpush3.msra.mxu0 %v3153_v59  ;;  %2426 = vmatprep.mubr.f32.mxu0 %v3110_v25 }
  0x53   :  { %2452 = vmatpush3.msra.mxu1 %v3051_v47  ;;  %2427 = vmatmul.mubr.f32.vlgmr.msra.gmra.mxu0 %v3119_v32 }
  0x54   :  { %2453 = vmatprep.subr.mxu1 %v3069_v57  ;;  %2464 = vmatprep.subr.mxu0 %v2985_v21 }
  0x55   :  { %2454 = vmatpush3.msra.mxu1 %v3069_v57  ;;  %2465 = vmatpush3.msra.mxu0 %v2985_v21 }
  0x56   :  { %2455 = vmatprep.subr.mxu1 %v3098_v8  ;;  %2466 = vmatprep.subr.mxu0 %v2988_v22 }
  0x57   :  { %2456 = vmatpush3.msra.mxu1 %v3098_v8  ;;  %2467 = vmatpush3.msra.mxu0 %v2988_v22 }
  0x58   :  { %2457 = vmatprep.subr.mxu1 %v3116_v31  ;;  %2468 = vmatprep.subr.mxu0 %v2991_v23 }
  0x59   :  { %2458 = vmatpush3.msra.mxu1 %v3116_v31  ;;  %2469 = vmatpush3.msra.mxu0 %v2991_v23 }
  0x5a   :  { %2459 = vmatprep.subr.mxu1 %v3128_v38  ;;  %2470 = vmatprep.subr.mxu0 %v3000_v26 }
  0x5b   :  { %2460 = vmatpush3.msra.mxu1 %v3128_v38  ;;  %2461 = vmatprep.mubr.f32.mxu1 %v3849_v14 }
  0x5c   :  { %2471 = vmatpush3.msra.mxu0 %v3000_v26  ;;  %2462 = vmatmul.mubr.f32.vlgmr.msra.gmra.mxu1 %v3850_v15 }
  0x5d   :  { %2472 = vmatprep.subr.mxu0 %v3005_v28  ;;  %2499 = vmatprep.subr.mxu1 %v2934_v3 }
  0x5e   :  { %2473 = vmatpush3.msra.mxu0 %v3005_v28  ;;  %2500 = vmatpush3.msra.mxu1 %v2934_v3  ;;  %v769_v3 = vld [vmem:[%s3841_s3 + $0x18] sm:$0xff] }
  0x5f   :  { %2474 = vmatprep.subr.mxu0 %v3030_v39  ;;  %2501 = vmatprep.subr.mxu1 %v2936_v4 }
  0x60   :  { %2475 = vmatpush3.msra.mxu0 %v3030_v39  ;;  %2502 = vmatpush3.msra.mxu1 %v2936_v4  ;;  %v3326_v4 = vand.u32 4294901760, %v769_v3 }
  0x61   :  { %2476 = vmatprep.subr.mxu0 %v3039_v42  ;;  %2503 = vmatprep.subr.mxu1 %v2938_v5 }
  0x62   :  { %2477 = vmatpush3.msra.mxu0 %v3039_v42  ;;  %2504 = vmatpush3.msra.mxu1 %v2938_v5  ;;  %v768_v5 = vld [vmem:[%s3841_s3 + $0x10] sm:$0xff] }
  0x63   :  { %2478 = vmatprep.subr.mxu0 %v3060_v52  ;;  %2505 = vmatprep.subr.mxu1 %v2949_v9 }
  0x64   :  { %2479 = vmatpush3.msra.mxu0 %v3060_v52  ;;  %2506 = vmatpush3.msra.mxu1 %v2949_v9  ;;  %v3332_v9 = vsub.f32 %v769_v3, %v3326_v4 }
  0x65   :  { %2480 = vmatprep.subr.mxu0 %v3072_v58  ;;  %2507 = vmatprep.subr.mxu1 %v2951_v10 }
  0x66   :  { %2481 = vmatpush3.msra.mxu0 %v3072_v58  ;;  %2508 = vmatpush3.msra.mxu1 %v2951_v10  ;;  %v3334_v10 = vand.u32 4294901760, %v768_v5 }
  0x67   :  { %2482 = vmatprep.subr.mxu0 %v3089_v1  ;;  %2509 = vmatprep.subr.mxu1 %v2953_v11 }
  0x68   :  { %2483 = vmatpush3.msra.mxu0 %v3089_v1  ;;  %2510 = vmatpush3.msra.mxu1 %v2953_v11  ;;  %v767_v11 = vld [vmem:[%s3841_s3 + $0x8] sm:$0xff]  ;;  %v3345_v17 = vsub.f32 %v768_v5, %v3334_v10 }
  0x69   :  { %2484 = vmatprep.subr.mxu0 %v3104_v13  ;;  %2511 = vmatprep.subr.mxu1 %v2968_v16  ;;  %v3347_v19 = vand.u32 4294901760, %v767_v11 }
  0x6a   :  { %2485 = vmatpush3.msra.mxu0 %v3104_v13  ;;  %2512 = vmatpush3.msra.mxu1 %v2968_v16  ;;  %v3342_v16 = vand.u32 4294901760, %v3332_v9  ;;  %v3357_v22 = vand.u32 4294901760, %v3345_v17 }
  0x6b   :  { %2486 = vmatprep.subr.mxu0 %v3125_v37  ;;  %2513 = vmatprep.subr.mxu1 %v2993_v24  ;;  %v3360_v23 = vsub.f32 %v767_v11, %v3347_v19 }
  0x6c   :  { %2487 = vmatpush3.msra.mxu0 %v3125_v37  ;;  %2514 = vmatpush3.msra.mxu1 %v2993_v24  ;;  %v893_v21 = vsub.f32 %v3332_v9, %v3342_v16  ;;  %v3362_v24 = vand.u32 4294901760, %v766_v20 }
  0x6d   :  { %2488 = vmatprep.subr.mxu0 %v3138_v49  ;;  %2515 = vmatprep.subr.mxu1 %v3002_v27  ;;  %v3369_v28 = vand.u32 4294901760, %v3360_v23 }
  0x6e   :  { %2489 = vmatpush3.msra.mxu0 %v3138_v49  ;;  %2516 = vmatpush3.msra.mxu1 %v3002_v27  ;;  %v894_v26 = vand.u32 4294901760, %v893_v21  ;;  %v900_v27 = vsub.f32 %v3345_v17, %v3357_v22  ;;  %v3372_v29 = vsub.f32 %v766_v20, %v3362_v24 }
  0x6f   :  { %2490 = vmatprep.subr.mxu0 %v3150_v56  ;;  %2517 = vmatprep.subr.mxu1 %v3021_v34 }
  0x70   :  { %2491 = vmatpush3.msra.mxu0 %v3150_v56  ;;  %2518 = vmatpush3.msra.mxu1 %v3021_v34  ;;  %v901_v33 = vand.u32 4294901760, %v900_v27  ;;  %v907_v34 = vsub.f32 %v3360_v23, %v3369_v28  ;;  %v3379_v39 = vand.u32 4294901760, %v3372_v29 }
  0x71   :  { %2492 = vmatprep.subr.mxu0 %v3166_v12  ;;  %2519 = vmatprep.subr.mxu1 %v3045_v45 }
  0x72   :  { %2493 = vmatpush3.msra.mxu0 %v3166_v12  ;;  %2520 = vmatpush3.msra.mxu1 %v3045_v45  ;;  %v908_v42 = vand.u32 4294901760, %v907_v34  ;;  %v914_v43 = vsub.f32 %v3372_v29, %v3379_v39 }
  0x73   :  { %2494 = vmatprep.subr.mxu0 %v3173_v36  ;;  %2521 = vmatprep.subr.mxu1 %v3051_v47 }
  0x74   :  { %2495 = vmatpush3.msra.mxu0 %v3173_v36  ;;  %2496 = vmatprep.mubr.f32.mxu0 %v3080_v61  ;;  %v915_v45 = vand.u32 4294901760, %v914_v43 }
  0x75   :  { %2522 = vmatpush3.msra.mxu1 %v3051_v47  ;;  %2497 = vmatmul.mubr.f32.vlgmr.msra.gmra.mxu0 %v3083_v62  ;;  %v2068_v47 = vld [vmem:[%s3840_s2] ss:$0 sm:$0xff] }
  0x76   :  { %2523 = vmatprep.subr.mxu1 %v3069_v57  ;;  %2531 = vmatprep.mubr.f32.mxu1 %v3080_v61 }
  0x77   :  { %2524 = vmatpush3.msra.mxu1 %v3069_v57  ;;  %2534 = vmatprep.subr.mxu0 %v3326_v4 }
  0x78   :  { %2525 = vmatprep.subr.mxu1 %v3098_v8  ;;  %2535 = vmatpush3.msra.mxu0 %v3326_v4 }
  0x79   :  { %2526 = vmatpush3.msra.mxu1 %v3098_v8  ;;  %2536 = vmatprep.subr.mxu0 %v3334_v10 }
  0x7a   :  { %2527 = vmatprep.subr.mxu1 %v3116_v31  ;;  %2537 = vmatpush3.msra.mxu0 %v3334_v10 }
  0x7b   :  { %2528 = vmatpush3.msra.mxu1 %v3116_v31  ;;  %2538 = vmatprep.subr.mxu0 %v3347_v19 }
  0x7c   :  { %2529 = vmatprep.subr.mxu1 %v3128_v38  ;;  %2539 = vmatpush3.msra.mxu0 %v3347_v19 }
  0x7d   :  { %2530 = vmatpush3.msra.mxu1 %v3128_v38  ;;  %2540 = vmatprep.subr.mxu0 %v3362_v24 }
  0x7e   :  { %2532 = vmatmul.mubr.f32.vlgmr.msra.gmra.mxu1 %v3083_v62  ;;  %2541 = vmatpush3.msra.mxu0 %v3362_v24 }
  0x7f   :  { %2545 = vmatprep.subr.mxu1 %v894_v26  ;;  %2556 = vmatprep.subr.mxu0 %v3332_v9 }
  0x80   :  { %2546 = vmatpush3.msra.mxu1 %v894_v26 }
  0x81   :  { %2547 = vmatprep.subr.mxu1 %v901_v33 }
  0x82   :  { %2548 = vmatpush3.msra.mxu1 %v901_v33 }
  0x83   :  { %2549 = vmatprep.subr.mxu1 %v908_v42 }
  0x84   :  { %2550 = vmatpush3.msra.mxu1 %v908_v42 }
  0x85   :  { %2551 = vmatprep.subr.mxu1 %v915_v45 }
  0x86   :  { %2552 = vmatpush3.msra.mxu1 %v915_v45 }
  0x87   :  { %2567 = vmatprep.subr.mxu1 %v3326_v4 }
  0xf2   :  { %v2358_v46 = vpop.f32.mrf.mxu0 }
  0xf3   :  { %v167_v58 = vadd.f32 %v2358_v46, %v2068_v47 }
  0xf4   :  { %v156_v52 = vpop.f32.mrf.mxu0 }
  0xf5   :  { %v157_v61 = vadd.f32 %v2068_v47, %v156_v52 }
  0xfa   :  { %v2393_v53 = vpop.f32.mrf.mxu1 }
  0xfb   :  { %v324_v6 = vadd.f32 %v2393_v53, %v167_v58 }
  0xfc   :  { %v317_v60 = vpop.f32.mrf.mxu1 }
  0xfd   :  { %v318_v13 = vadd.f32 %v317_v60, %v157_v61  ;;  %v2069_v61 = vld [vmem:[%s3842_s4] ss:$0 sm:$0xff] }
 0x113   :  { %v2428_v57 = vpop.f32.mrf.mxu0 }
 0x114   :  { %v435_v25 = vadd.f32 %v2428_v57, %v324_v6 }
 0x115   :  { %v427_v62 = vpop.f32.mrf.mxu0 }
 0x116   :  { %v428_v31 = vadd.f32 %v427_v62, %v318_v13 }
 0x11c   :  { %v2463_v1 = vpop.f32.mrf.mxu1 }
 0x11d   :  { %v532_v32 = vadd.f32 %v2463_v1, %v435_v25  ;;  %v2070_v1 = vld [vmem:[%s3843_s5] ss:$0 sm:$0xff]  ;;  %v1357_v25 = vld [vmem:[%s3844_s6 + $0x78] sm:$0xff] }
 0x11e   :  { %v523_v30 = vpop.f32.mrf.mxu1 }
 0x11f   :  { %v524_v38 = vadd.f32 %v523_v30, %v428_v31  ;;  %v1356_v30 = vld [vmem:[%s3844_s6 + $0x70] sm:$0xff]  ;;  %v1355_v31 = vld [vmem:[%s3844_s6 + $0x68] sm:$0xff] }
 0x135   :  { %v2498_v8 = vpop.f32.mrf.mxu0 }
 0x136   :  { %v657_v40 = vadd.f32 %v2498_v8, %v532_v32  ;;  %v3443_v32 = vand.u32 4294901760, %v1357_v25 }
 0x137   :  { %v650_v37 = vpop.f32.mrf.mxu0 }
 0x138   :  { %v651_v49 = vadd.f32 %v650_v37, %v524_v38  ;;  %v3445_v37 = vand.u32 4294901760, %v1356_v30  ;;  %v3447_v38 = vand.u32 4294901760, %v1355_v31 }
 0x13e   :  { %v2533_v48 = vpop.f32.mrf.mxu1 }
 0x13f   :  { %v750_v50 = vadd.f32 %v2533_v48, %v657_v40  ;;  %v1354_v40 = vld [vmem:[%s3844_s6 + $0x60] sm:$0xff]  ;;  %v1353_v48 = vld [vmem:[%s3844_s6 + $0x58] sm:$0xff] }
 0x140   :  { %v743_v51 = vpop.f32.mrf.mxu1 }
 0x141   :  { %v774_v56 = vsel %vm755_vm0, %v750_v50, 0  ;;  %v744_v59 = vadd.f32 %v743_v51, %v651_v49  ;;  %v754_v44 = vmul.f32 %v750_v50, %v750_v50  ;;  %v1352_v49 = vld [vmem:[%s3844_s6 + $0x50] sm:$0xff]  ;;  %v3458_v50 = vand.u32 4294901760, %v1354_v40 }
 0x142   :  { %v855_v2 = vand.u32 4294901760, %v774_v56  ;;  %v3460_v51 = vand.u32 4294901760, %v1353_v48 }
 0x143   :  { %v771_v7 = vsel %vm755_vm0, %v744_v59, 0  ;;  %v753_v12 = vmul.f32 %v744_v59, %v744_v59  ;;  %v759_v63 = vsel %vm755_vm0, %v754_v44, 0.0  ;;  %v3465_v59 = vsub.f32 %v1357_v25, %v3443_v32  ;;  %v1346_v25 = vld [vmem:[%s3844_s6 + $0x20] sm:$0xff] }
 0x144   :  { %v856_v18 = vsub.f32 %v774_v56, %v855_v2  ;;  %v845_v35 = vand.u32 4294901760, %v771_v7  ;;  %v3462_v56 = vand.u32 4294901760, %v1352_v49 }
 0x145   :  { %v756_v36 = vsel %vm755_vm0, %v753_v12, 0.0  ;;  %v3475_v12 = vsub.f32 %v1354_v40, %v3458_v50 }
 0x146   :  { %v846_v41 = vsub.f32 %v771_v7, %v845_v35  ;;  %2553 = vmatprep.mubr.f32.mxu1 %v845_v35  ;;  %757 = vadd.xlane.f32.xlu0 %v756_v36  ;;  %v857_v55 = vand.u32 4294901760, %v856_v18  ;;  %v3471_v7 = vsub.f32 %v1355_v31, %v3447_v38  ;;  %v3492_v44 = vsub.f32 %v1352_v49, %v3462_v56 }
 0x147   :  { %2554 = vmatmul.mubr.f32.vlgmr.msra.gmra.mxu1 %v855_v2 }
 0x148   :  { %2568 = vmatpush3.msra.mxu1 %v3326_v4  ;;  %v847_v54 = vand.u32 4294901760, %v846_v41  ;;  %v858_v14 = vsub.f32 %v856_v18, %v857_v55 }
 0x149   :  { %2569 = vmatprep.subr.mxu1 %v3334_v10 }
 0x14a   :  { %2570 = vmatpush3.msra.mxu1 %v3334_v10  ;;  %2575 = vmatprep.mubr.f32.mxu1 %v847_v54  ;;  %v848_v0 = vsub.f32 %v846_v41, %v847_v54  ;;  %v859_v3 = vand.u32 4294901760, %v858_v14 }
 0x14b   :  { %2571 = vmatprep.subr.mxu1 %v3347_v19  ;;  %760 = vadd.xlane.f32.xlu0 %v759_v63 }
 0x14c   :  { %2572 = vmatpush3.msra.mxu1 %v3347_v19  ;;  %v849_v15 = vand.u32 4294901760, %v848_v0 }
 0x14d   :  { %2573 = vmatprep.subr.mxu1 %v3362_v24 }
 0x14e   :  { %2574 = vmatpush3.msra.mxu1 %v3362_v24  ;;  %2542 = vmatprep.mubr.f32.mxu0 %v849_v15 }
 0x14f   :  { %2576 = vmatmul.mubr.f32.vlgmr.msra.gmra.mxu1 %v857_v55  ;;  %2589 = vmatprep.subr.mxu1 %v3326_v4  ;;  %v3495_v55 = vand.u32 4294901760, %v3475_v12 }
 0x150   :  { %2543 = vmatmul.mubr.f32.vlgmr.msra.gmra.mxu0 %v859_v3  ;;  %2590 = vmatpush3.msra.mxu1 %v3326_v4 }
 0x151   :  { %2557 = vmatpush3.msra.mxu0 %v3332_v9  ;;  %2597 = vmatprep.mubr.f32.mxu1 %v845_v35 }
 0x152   :  { %2558 = vmatprep.subr.mxu0 %v3345_v17  ;;  %2564 = vmatprep.mubr.f32.mxu0 %v846_v41  ;;  %v3488_v41 = vand.u32 4294901760, %v3471_v7 }
 0x153   :  { %2591 = vmatprep.subr.mxu1 %v3334_v10  ;;  %2559 = vmatpush3.msra.mxu0 %v3345_v17 }
 0x154   :  { %2592 = vmatpush3.msra.mxu1 %v3334_v10  ;;  %2560 = vmatprep.subr.mxu0 %v3360_v23  ;;  %v1484_v0 = vsub.f32 %v3471_v7, %v3488_v41 }
 0x155   :  { %2593 = vmatprep.subr.mxu1 %v3347_v19  ;;  %2561 = vmatpush3.msra.mxu0 %v3360_v23 }
 0x156   :  { %2594 = vmatpush3.msra.mxu1 %v3347_v19  ;;  %2562 = vmatprep.subr.mxu0 %v3372_v29 }
 0x157   :  { %2595 = vmatprep.subr.mxu1 %v3362_v24  ;;  %2563 = vmatpush3.msra.mxu0 %v3372_v29 }
 0x158   :  { %2596 = vmatpush3.msra.mxu1 %v3362_v24  ;;  %2565 = vmatmul.mubr.f32.vlgmr.msra.gmra.mxu0 %v856_v18  ;;  %v3478_v18 = vsub.f32 %v1353_v48, %v3460_v51  ;;  %v3598_v48 = vand.u32 4294901760, %v1346_v25 }
 0x159   :  { %2578 = vmatprep.subr.mxu0 %v3342_v16  ;;  %2598 = vmatmul.mubr.f32.vlgmr.msra.gmra.mxu1 %v855_v2 }
 0x15a   :  { %2579 = vmatpush3.msra.mxu0 %v3342_v16  ;;  %2586 = vmatprep.mubr.f32.mxu0 %v845_v35  ;;  %v3482_v35 = vand.u32 4294901760, %v3465_v59  ;;  %v3505_v14 = vand.u32 4294901760, %v3478_v18 }
 0x15b   :  { %2580 = vmatprep.subr.mxu0 %v3357_v22 }
 0x15c   :  { %2581 = vmatpush3.msra.mxu0 %v3357_v22  ;;  %v1470_v54 = vsub.f32 %v3465_v59, %v3482_v35 }
 0x15d   :  { %2582 = vmatprep.subr.mxu0 %v3369_v28 }
 0x15e   :  { %2583 = vmatpush3.msra.mxu0 %v3369_v28  ;;  %v1471_v15 = vand.u32 4294901760, %v1470_v54  ;;  %v1345_v54 = vld [vmem:[%s3844_s6 + $0x18] sm:$0xff] }
 0x15f   :  { %2584 = vmatprep.subr.mxu0 %v3379_v39 }
 0x160   :  { %2585 = vmatpush3.msra.mxu0 %v3379_v39  ;;  %2635 = vmatprep.subr.mxu1 %v1471_v15 }
 0x161   :  { %2587 = vmatmul.mubr.f32.vlgmr.msra.gmra.mxu0 %v855_v2  ;;  %v3468_v2 = vsub.f32 %v1356_v30, %v3445_v37  ;;  %2600 = vmatprep.subr.mxu0 %v3443_v32 }
 0x162   :  { %2601 = vmatpush3.msra.mxu0 %v3443_v32  ;;  %2636 = vmatpush3.msra.mxu1 %v1471_v15  ;;  %v3610_v15 = vsub.f32 %v1346_v25, %v3598_v48 }
 0x163   :  { %v3485_v36 = vand.u32 4294901760, %v3468_v2  ;;  %2602 = vmatprep.subr.mxu0 %v3445_v37 }
 0x164   :  { %2603 = vmatpush3.msra.mxu0 %v3445_v37 }
 0x165   :  { %v1477_v63 = vsub.f32 %v3468_v2, %v3485_v36  ;;  %2604 = vmatprep.subr.mxu0 %v3447_v38 }
 0x166   :  { %2605 = vmatpush3.msra.mxu0 %v3447_v38 }
 0x167   :  { %v1478_v3 = vand.u32 4294901760, %v1477_v63  ;;  %2606 = vmatprep.subr.mxu0 %v3458_v50 }
 0x168   :  { %2607 = vmatpush3.msra.mxu0 %v3458_v50 }
 0x169   :  { %2608 = vmatprep.subr.mxu0 %v3460_v51  ;;  %2637 = vmatprep.subr.mxu1 %v1478_v3 }
 0x16a   :  { %2609 = vmatpush3.msra.mxu0 %v3460_v51  ;;  %2638 = vmatpush3.msra.mxu1 %v1478_v3  ;;  %v3612_v3 = vand.u32 4294901760, %v1345_v54 }
 0x16b   :  { %2610 = vmatprep.subr.mxu0 %v3462_v56 }
 0x16c   :  { %2611 = vmatpush3.msra.mxu0 %v3462_v56 }
 0x1cf   :  { %v758_v4 = vpop.xlane.xlu0 %757 }
 0x1d0   :  { %v762_v10 = vadd.f32 1e-06, %v758_v4  ;;  %v1491_v4 = vsub.f32 %v3475_v12, %v3495_v55 }
 0x1d2   :  { %2814 = vrsqrt.f32 %v762_v10  ;;  %v1498_v10 = vsub.f32 %v3478_v18, %v3505_v14 }
 0x1d4   :  { %v761_v9 = vpop.xlane.xlu0 %760 }
 0x1d5   :  { %v763_v16 = vadd.f32 1e-06, %v761_v9  ;;  %v1485_v9 = vand.u32 4294901760, %v1484_v0 }
 0x1d7   :  { %2816 = vrsqrt.f32 %v763_v16  ;;  %2639 = vmatprep.subr.mxu1 %v1485_v9 }
 0x1d8   :  { %2640 = vmatpush3.msra.mxu1 %v1485_v9  ;;  %v1344_v9 = vld [vmem:[%s3844_s6 + $0x10] sm:$0xff] }
 0x1df   :  { %v2815_v52 = vpop.eup %2814 }
 0x1e4   :  { %v2817_v57 = vpop.eup %2816 }
 0x207   :  { %v2555_v11 = vpop.f32.mrf.mxu1 }
 0x209   :  { %v952_v20 = vpop.f32.mrf.mxu1 }
 0x20f   :  { %v2577_v22 = vpop.f32.mrf.mxu1 }
 0x210   :  { %v2544_v5 = vpop.f32.mrf.mxu0 }
 0x211   :  { %v959_v21 = vadd.f32 %v2555_v11, %v2544_v5  ;;  %v1122_v28 = vpop.f32.mrf.mxu1  ;;  %v3512_v5 = vand.u32 4294901760, %v3492_v44  ;;  %v1492_v11 = vand.u32 4294901760, %v1491_v4 }
 0x212   :  { %v851_v17 = vpop.f32.mrf.mxu0 }
 0x213   :  { %v953_v24 = vadd.f32 %v952_v20, %v851_v17  ;;  %v1505_v16 = vsub.f32 %v3492_v44, %v3512_v5  ;;  %v1499_v17 = vand.u32 4294901760, %v1498_v10  ;;  %2641 = vmatprep.subr.mxu1 %v1492_v11  ;;  %v1343_v10 = vld [vmem:[%s3844_s6 + $0x8] sm:$0xff] }
 0x214   :  { %2642 = vmatpush3.msra.mxu1 %v1492_v11 }
 0x215   :  { %2643 = vmatprep.subr.mxu1 %v1499_v17 }
 0x216   :  { %2644 = vmatpush3.msra.mxu1 %v1499_v17  ;;  %v3629_v17 = vsub.f32 %v1345_v54, %v3612_v3 }
 0x218   :  { %v2566_v19 = vpop.f32.mrf.mxu0 }
 0x219   :  { %v1046_v26 = vadd.f32 %v2566_v19, %v959_v21  ;;  %v2599_v33 = vpop.f32.mrf.mxu1  ;;  %v1506_v19 = vand.u32 4294901760, %v1505_v16  ;;  %v3626_v16 = vand.u32 4294901760, %v3610_v15 }
 0x21a   :  { %v1038_v23 = vpop.f32.mrf.mxu0 }
 0x21b   :  { %v1039_v27 = vadd.f32 %v1038_v23, %v953_v24  ;;  %v1131_v29 = vadd.f32 %v2577_v22, %v1046_v26  ;;  %v1294_v47 = vpop.f32.mrf.mxu1  ;;  %2645 = vmatprep.subr.mxu1 %v1506_v19 }
 0x21c   :  { %2646 = vmatpush3.msra.mxu1 %v1506_v19  ;;  %v3631_v19 = vand.u32 4294901760, %v1344_v9 }
 0x21d   :  { %v1123_v42 = vadd.f32 %v1122_v28, %v1039_v27  ;;  %v1351_v28 = vld [vmem:[%s3844_s6 + $0x48] sm:$0xff] }
 0x221   :  { %v2588_v34 = vpop.f32.mrf.mxu0 }
 0x222   :  { %v1220_v39 = vadd.f32 %v2588_v34, %v1131_v29  ;;  %v3532_v29 = vand.u32 4294901760, %v1351_v28 }
 0x223   :  { %v1213_v43 = vpop.f32.mrf.mxu0 }
 0x224   :  { %v1301_v45 = vadd.f32 %v2599_v33, %v1220_v39  ;;  %v1214_v46 = vadd.f32 %v1213_v43, %v1123_v42  ;;  %v1350_v33 = vld [vmem:[%s3844_s6 + $0x40] sm:$0xff]  ;;  %v3540_v39 = vsub.f32 %v1351_v28, %v3532_v29  ;;  %2612 = vmatprep.subr.mxu0 %v3532_v29  ;;  %v1349_v43 = vld [vmem:[%s3844_s6 + $0x38] sm:$0xff] }
 0x225   :  { %v3542_v42 = vand.u32 4294901760, %v1350_v33  ;;  %2613 = vmatpush3.msra.mxu0 %v3532_v29 }
 0x226   :  { %v1295_v53 = vadd.f32 %v1294_v47, %v1214_v46  ;;  %v1305_v58 = vmul.f32 %v2817_v57, %v1301_v45  ;;  %v3551_v45 = vand.u32 4294901760, %v3540_v39  ;;  %v3556_v47 = vand.u32 4294901760, %v1349_v43 }
 0x227   :  { %v3554_v46 = vsub.f32 %v1350_v33, %v3542_v42  ;;  %2614 = vmatprep.subr.mxu0 %v3542_v42  ;;  %v1342_v33 = vld [vmem:[%s3844_s6] sm:$0xff] }
 0x228   :  { %v1304_v60 = vmul.f32 %v2815_v52, %v1295_v53  ;;  %v1314_v8 = vmul.f32 %v2069_v61, %v1305_v58  ;;  %v1348_v52 = vld [vmem:[%s3844_s6 + $0x30] sm:$0xff]  ;;  %2615 = vmatpush3.msra.mxu0 %v3542_v42  ;;  %v1512_v53 = vsub.f32 %v3540_v39, %v3551_v45  ;;  %v3569_v58 = vsub.f32 %v1349_v43, %v3556_v47 }
 0x229   :  { %v3566_v57 = vand.u32 4294901760, %v3554_v46  ;;  %2616 = vmatprep.subr.mxu0 %v3556_v47 }
 0x22a   :  { %v1313_v62 = vmul.f32 %v2069_v61, %v1304_v60  ;;  %v3431_v13 = vadd.f32 %v2070_v1, %v1314_v8  ;;  %v3571_v60 = vand.u32 4294901760, %v1348_v52  ;;  %v1347_v61 = vld [vmem:[%s3844_s6 + $0x28] sm:$0xff]  ;;  %2617 = vmatpush3.msra.mxu0 %v3556_v47 }
 0x22c   :  { %v3428_v6 = vadd.f32 %v2070_v1, %v1313_v62  ;;  %v1513_v62 = vand.u32 4294901760, %v1512_v53  ;;  %v1519_v1 = vsub.f32 %v3554_v46, %v3566_v57  ;;  %v3584_v8 = vsub.f32 %v1348_v52, %v3571_v60  ;;  %2618 = vmatprep.subr.mxu0 %v3571_v60 }
 0x22d   :  { %2619 = vmatpush3.msra.mxu0 %v3571_v60 }
 0x22e   :  { %1324 = vmax.xlane.f32.xlu1 %v3428_v6  ;;  %2647 = vmatprep.subr.mxu1 %v1513_v62  ;;  %v1520_v30 = vand.u32 4294901760, %v1519_v1  ;;  %v3596_v40 = vand.u32 4294901760, %v3584_v8 }
 0x22f   :  { %2648 = vmatpush3.msra.mxu1 %v1513_v62 }
 0x230   :  { %2649 = vmatprep.subr.mxu1 %v1520_v30  ;;  %v1533_v0 = vsub.f32 %v3584_v8, %v3596_v40 }
 0x231   :  { %2650 = vmatpush3.msra.mxu1 %v1520_v30 }
 0x232   :  { %1326 = vmax.xlane.f32.xlu1 %v3431_v13  ;;  %v1534_v11 = vand.u32 4294901760, %v1533_v0 }
 0x2b7   :  { %v1325_v20 = vpop.xlane.xlu1 %1324 }
 0x2b8   :  { %v1328_v21 = vsub.f32 %v3428_v6, %v1325_v20  ;;  %v3581_v6 = vand.u32 4294901760, %v3569_v58 }
 0x2ba   :  { %v1330_v22 = vmul.f32 1.442695, %v1328_v21  ;;  %v1526_v31 = vsub.f32 %v3569_v58, %v3581_v6  ;;  %v3636_v21 = vand.u32 4294901760, %v1343_v10 }
 0x2bb   :  { %v1327_v23 = vpop.xlane.xlu1 %1326 }
 0x2bc   :  { %2818 = vpow2.f32 %v1330_v22  ;;  %v1329_v24 = vsub.f32 %v3431_v13, %v1327_v23  ;;  %v3587_v13 = vand.u32 4294901760, %v1347_v61  ;;  %v1527_v63 = vand.u32 4294901760, %v1526_v31 }
 0x2bd   :  { %v1547_v22 = vsub.f32 %v3610_v15, %v3626_v16  ;;  %v3642_v23 = vand.u32 4294901760, %v3629_v17  ;;  %v3649_v28 = vsub.f32 %v1343_v10, %v3636_v21 }
 0x2be   :  { %v1332_v26 = vmul.f32 1.442695, %v1329_v24  ;;  %v3601_v49 = vsub.f32 %v1347_v61, %v3587_v13  ;;  %2620 = vmatprep.subr.mxu0 %v3587_v13  ;;  %2651 = vmatprep.subr.mxu1 %v1527_v63  ;;  %v3645_v24 = vsub.f32 %v1344_v9, %v3631_v19  ;;  %v3660_v61 = vand.u32 4294901760, %v1342_v33 }
 0x2bf   :  { %2621 = vmatpush3.msra.mxu0 %v3587_v13  ;;  %2652 = vmatpush3.msra.mxu1 %v1527_v63  ;;  %v1548_v43 = vand.u32 4294901760, %v1547_v22  ;;  %v1554_v52 = vsub.f32 %v3629_v17, %v3642_v23  ;;  %v3664_v62 = vand.u32 4294901760, %v3649_v28 }
 0x2c0   :  { %2820 = vpow2.f32 %v1332_v26  ;;  %v3616_v4 = vand.u32 4294901760, %v3601_v49  ;;  %2622 = vmatprep.subr.mxu0 %v3598_v48  ;;  %2653 = vmatprep.subr.mxu1 %v1534_v11  ;;  %v3658_v53 = vand.u32 4294901760, %v3645_v24  ;;  %v3670_v30 = vsub.f32 %v1342_v33, %v3660_v61 }
 0x2c1   :  { %2623 = vmatpush3.msra.mxu0 %v3598_v48  ;;  %2654 = vmatpush3.msra.mxu1 %v1534_v11  ;;  %v1555_v1 = vand.u32 4294901760, %v1554_v52  ;;  %v1568_v31 = vsub.f32 %v3649_v28, %v3664_v62 }
 0x2c2   :  { %v1540_v20 = vsub.f32 %v3601_v49, %v3616_v4  ;;  %2624 = vmatprep.subr.mxu0 %v3612_v3  ;;  %v1561_v25 = vsub.f32 %v3645_v24, %v3658_v53  ;;  %v3677_v63 = vand.u32 4294901760, %v3670_v30 }
 0x2c3   :  { %2625 = vmatpush3.msra.mxu0 %v3612_v3  ;;  %v1569_v0 = vand.u32 4294901760, %v1568_v31 }
 0x2c4   :  { %v1541_v26 = vand.u32 4294901760, %v1540_v20  ;;  %2626 = vmatprep.subr.mxu0 %v3631_v19  ;;  %v1562_v54 = vand.u32 4294901760, %v1561_v25  ;;  %v1575_v9 = vsub.f32 %v3670_v30, %v3677_v63 }
 0x2c5   :  { %2627 = vmatpush3.msra.mxu0 %v3631_v19 }
 0x2c6   :  { %2655 = vmatprep.subr.mxu1 %v1541_v26  ;;  %2628 = vmatprep.subr.mxu0 %v3636_v21  ;;  %v1576_v10 = vand.u32 4294901760, %v1575_v9 }
 0x2c7   :  { %2656 = vmatpush3.msra.mxu1 %v1541_v26  ;;  %2629 = vmatpush3.msra.mxu0 %v3636_v21 }
 0x2c8   :  { %2657 = vmatprep.subr.mxu1 %v1548_v43  ;;  %2630 = vmatprep.subr.mxu0 %v3660_v61 }
 0x2c9   :  { %v3526_v27 = vpop.eup %2818  ;;  %2658 = vmatpush3.msra.mxu1 %v1548_v43  ;;  %2631 = vmatpush3.msra.mxu0 %v3660_v61 }
 0x2ca   :  { %1334 = vadd.xlane.f32.xlu0 %v3526_v27  ;;  %2659 = vmatprep.subr.mxu1 %v1555_v1 }
 0x2cb   :  { %2670 = vmatprep.subr.mxu0 %v3465_v59  ;;  %2660 = vmatpush3.msra.mxu1 %v1555_v1 }
 0x2cc   :  { %2661 = vmatprep.subr.mxu1 %v1562_v54 }
 0x2cd   :  { %v3537_v34 = vpop.eup %2820  ;;  %2662 = vmatpush3.msra.mxu1 %v1562_v54 }
 0x2ce   :  { %1336 = vadd.xlane.f32.xlu1 %v3537_v34  ;;  %2663 = vmatprep.subr.mxu1 %v1569_v0 }
 0x2cf   :  { %2664 = vmatpush3.msra.mxu1 %v1569_v0 }
 0x2d0   :  { %2665 = vmatprep.subr.mxu1 %v1576_v10 }
 0x2d1   :  { %2666 = vmatpush3.msra.mxu1 %v1576_v10 }
 0x2d2   :  { %2705 = vmatprep.subr.mxu1 %v3443_v32 }
 0x353   :  { %v1335_v11 = vpop.xlane.xlu0 %1334 }
 0x354   :  { %2822 = vrcp.f32 %v1335_v11 }
 0x357   :  { %v1337_v20 = vpop.xlane.xlu1 %1336 }
 0x358   :  { %2824 = vrcp.f32 %v1337_v20 }
 0x361   :  { %v2823_v22 = vpop.eup %2822 }
 0x362   :  { %v1339_v26 = vmul.f32 %v2823_v22, %v3526_v27 }
 0x364   :  { %v3685_v33 = vand.u32 4294901760, %v1339_v26 }
 0x365   :  { %v2825_v43 = vpop.eup %2824 }
 0x366   :  { %2667 = vmatprep.mubr.f32.mxu1 %v3685_v33  ;;  %v1341_v52 = vmul.f32 %v2825_v43, %v3537_v34  ;;  %v1447_v1 = vsub.f32 %v1339_v26, %v3685_v33 }
 0x368   :  { %v3690_v25 = vand.u32 4294901760, %v1341_v52  ;;  %v1448_v31 = vand.u32 4294901760, %v1447_v1 }
 0x36a   :  { %v3693_v54 = vsub.f32 %v1341_v52, %v3690_v25  ;;  %2668 = vmatmul.mubr.f32.vlgmr.msra.gmra.mxu1 %v3690_v25  ;;  %v1449_v0 = vsub.f32 %v1447_v1, %v1448_v31 }
 0x36b   :  { %2706 = vmatpush3.msra.mxu1 %v3443_v32  ;;  %2737 = vmatprep.mubr.f32.mxu1 %v1448_v31 }
 0x36c   :  { %2707 = vmatprep.subr.mxu1 %v3445_v37  ;;  %v1450_v27 = vand.u32 4294901760, %v1449_v0  ;;  %v1458_v9 = vand.u32 4294901760, %v3693_v54 }
 0x36d   :  { %2708 = vmatpush3.msra.mxu1 %v3445_v37 }
 0x36e   :  { %2709 = vmatprep.subr.mxu1 %v3447_v38  ;;  %2632 = vmatprep.mubr.f32.mxu0 %v1450_v27  ;;  %v1459_v34 = vsub.f32 %v3693_v54, %v1458_v9 }
 0x36f   :  { %2710 = vmatpush3.msra.mxu1 %v3447_v38 }
 0x370   :  { %2711 = vmatprep.subr.mxu1 %v3458_v50  ;;  %v1460_v10 = vand.u32 4294901760, %v1459_v34 }
 0x371   :  { %2712 = vmatpush3.msra.mxu1 %v3458_v50 }
 0x372   :  { %2713 = vmatprep.subr.mxu1 %v3460_v51  ;;  %2633 = vmatmul.mubr.f32.vlgmr.msra.gmra.mxu0 %v1460_v10 }
 0x373   :  { %2671 = vmatpush3.msra.mxu0 %v3465_v59  ;;  %2714 = vmatpush3.msra.mxu1 %v3460_v51 }
 0x374   :  { %2672 = vmatprep.subr.mxu0 %v3468_v2  ;;  %2702 = vmatprep.mubr.f32.mxu0 %v1447_v1 }
 0x375   :  { %2715 = vmatprep.subr.mxu1 %v3462_v56  ;;  %2673 = vmatpush3.msra.mxu0 %v3468_v2 }
 0x376   :  { %2716 = vmatpush3.msra.mxu1 %v3462_v56  ;;  %2674 = vmatprep.subr.mxu0 %v3471_v7 }
 0x377   :  { %2717 = vmatprep.subr.mxu1 %v3532_v29  ;;  %2675 = vmatpush3.msra.mxu0 %v3471_v7 }
 0x378   :  { %2718 = vmatpush3.msra.mxu1 %v3532_v29  ;;  %2676 = vmatprep.subr.mxu0 %v3475_v12 }
 0x379   :  { %2719 = vmatprep.subr.mxu1 %v3542_v42  ;;  %2677 = vmatpush3.msra.mxu0 %v3475_v12 }
 0x37a   :  { %2720 = vmatpush3.msra.mxu1 %v3542_v42  ;;  %2678 = vmatprep.subr.mxu0 %v3478_v18 }
 0x37b   :  { %2721 = vmatprep.subr.mxu1 %v3556_v47  ;;  %2679 = vmatpush3.msra.mxu0 %v3478_v18 }
 0x37c   :  { %2722 = vmatpush3.msra.mxu1 %v3556_v47  ;;  %2680 = vmatprep.subr.mxu0 %v3492_v44 }
 0x37d   :  { %2723 = vmatprep.subr.mxu1 %v3571_v60  ;;  %2681 = vmatpush3.msra.mxu0 %v3492_v44 }
 0x37e   :  { %2724 = vmatpush3.msra.mxu1 %v3571_v60  ;;  %2682 = vmatprep.subr.mxu0 %v3540_v39 }
 0x37f   :  { %2725 = vmatprep.subr.mxu1 %v3587_v13  ;;  %2683 = vmatpush3.msra.mxu0 %v3540_v39 }
 0x380   :  { %2726 = vmatpush3.msra.mxu1 %v3587_v13  ;;  %2684 = vmatprep.subr.mxu0 %v3554_v46 }
 0x381   :  { %2727 = vmatprep.subr.mxu1 %v3598_v48  ;;  %2685 = vmatpush3.msra.mxu0 %v3554_v46 }
 0x382   :  { %2728 = vmatpush3.msra.mxu1 %v3598_v48  ;;  %2686 = vmatprep.subr.mxu0 %v3569_v58 }
 0x383   :  { %2729 = vmatprep.subr.mxu1 %v3612_v3  ;;  %2687 = vmatpush3.msra.mxu0 %v3569_v58 }
 0x384   :  { %2730 = vmatpush3.msra.mxu1 %v3612_v3  ;;  %2688 = vmatprep.subr.mxu0 %v3584_v8 }
 0x385   :  { %2731 = vmatprep.subr.mxu1 %v3631_v19  ;;  %2689 = vmatpush3.msra.mxu0 %v3584_v8 }
 0x386   :  { %2732 = vmatpush3.msra.mxu1 %v3631_v19  ;;  %2690 = vmatprep.subr.mxu0 %v3601_v49 }
 0x387   :  { %2733 = vmatprep.subr.mxu1 %v3636_v21  ;;  %2691 = vmatpush3.msra.mxu0 %v3601_v49 }
 0x388   :  { %2734 = vmatpush3.msra.mxu1 %v3636_v21  ;;  %2692 = vmatprep.subr.mxu0 %v3610_v15 }
 0x389   :  { %2735 = vmatprep.subr.mxu1 %v3660_v61  ;;  %2693 = vmatpush3.msra.mxu0 %v3610_v15 }
 0x38a   :  { %2736 = vmatpush3.msra.mxu1 %v3660_v61  ;;  %2694 = vmatprep.subr.mxu0 %v3629_v17 }
 0x38b   :  { %2738 = vmatmul.mubr.f32.vlgmr.msra.gmra.mxu1 %v1458_v9  ;;  %2775 = vmatprep.subr.mxu1 %v3443_v32 }
 0x38c   :  { %2695 = vmatpush3.msra.mxu0 %v3629_v17  ;;  %2776 = vmatpush3.msra.mxu1 %v3443_v32 }
 0x38d   :  { %2807 = vmatprep.mubr.f32.mxu1 %v3685_v33  ;;  %2696 = vmatprep.subr.mxu0 %v3645_v24 }
 0x38e   :  { %2777 = vmatprep.subr.mxu1 %v3445_v37  ;;  %2697 = vmatpush3.msra.mxu0 %v3645_v24 }
 0x38f   :  { %2778 = vmatpush3.msra.mxu1 %v3445_v37  ;;  %2698 = vmatprep.subr.mxu0 %v3649_v28  ;;  %v2071_v37 = vld [vmem:[%s3845_s7] ss:$0 sm:$0xff]  ;;  %s2873_s7 = smov [#allocation5]  }
 0x390   :  { %2779 = vmatprep.subr.mxu1 %v3447_v38  ;;  %2699 = vmatpush3.msra.mxu0 %v3649_v28  ;;  %s2056_s0 = sshll.u32 %s2873_s7, 4  ;;  %s2057_s0 = int_to_ptr.vmem [resolvable:$true] %s2056_s0 }
 0x391   :  { %2780 = vmatpush3.msra.mxu1 %v3447_v38  ;;  %2700 = vmatprep.subr.mxu0 %v3670_v30  ;;  %s2846_s18 = scalar_lea.vmem %s2057_s0, 256  ;;  %p2851_p6 = scmp.lt.s32.totalorder %s2057_s0, %s2057_s0 }
 0x392   :  { %2781 = vmatprep.subr.mxu1 %v3458_v50  ;;  %2701 = vmatpush3.msra.mxu0 %v3670_v30  ;;  %p2847_p5 = scmp.ne.s32.totalorder %s2057_s0, %s2846_s18  ;;  %p2852_p7 = scmp.lt.s32.totalorder %s2846_s18, %s2846_s18 }
 0x393   :  { %2782 = vmatpush3.msra.mxu1 %v3458_v50  ;;  %2703 = vmatmul.mubr.f32.vlgmr.msra.gmra.mxu0 %v3693_v54 }
 0x394   :  { %2740 = vmatprep.subr.mxu0 %v3482_v35  ;;  %2783 = vmatprep.subr.mxu1 %v3460_v51  ;;  %p2853_p8 = por %p2852_p7, %p2851_p6 }
 0x395   :  { %2741 = vmatpush3.msra.mxu0 %v3482_v35  ;;  %2772 = vmatprep.mubr.f32.mxu0 %v3685_v33 }
 0x396   :  { %2784 = vmatpush3.msra.mxu1 %v3460_v51  ;;  %2742 = vmatprep.subr.mxu0 %v3485_v36  ;;  %p2854_p9 = pnand %p2853_p8, %p2847_p5 }
 0x397   :  { %2785 = vmatprep.subr.mxu1 %v3462_v56  ;;  %2743 = vmatpush3.msra.mxu0 %v3485_v36 }
 0x398   :  { %2786 = vmatpush3.msra.mxu1 %v3462_v56  ;;  %2744 = vmatprep.subr.mxu0 %v3488_v41 }
 0x399   :  { %2787 = vmatprep.subr.mxu1 %v3532_v29  ;;  %2745 = vmatpush3.msra.mxu0 %v3488_v41 }
 0x39a   :  { %2788 = vmatpush3.msra.mxu1 %v3532_v29  ;;  %2746 = vmatprep.subr.mxu0 %v3495_v55 }
 0x39b   :  { %2789 = vmatprep.subr.mxu1 %v3542_v42  ;;  %2747 = vmatpush3.msra.mxu0 %v3495_v55 }
 0x39c   :  { %2790 = vmatpush3.msra.mxu1 %v3542_v42  ;;  %2748 = vmatprep.subr.mxu0 %v3505_v14 }
 0x39d   :  { %2791 = vmatprep.subr.mxu1 %v3556_v47  ;;  %2749 = vmatpush3.msra.mxu0 %v3505_v14 }
 0x39e   :  { %2792 = vmatpush3.msra.mxu1 %v3556_v47  ;;  %2750 = vmatprep.subr.mxu0 %v3512_v5 }
 0x39f   :  { %2793 = vmatprep.subr.mxu1 %v3571_v60  ;;  %2751 = vmatpush3.msra.mxu0 %v3512_v5 }
 0x3a0   :  { %2794 = vmatpush3.msra.mxu1 %v3571_v60  ;;  %2752 = vmatprep.subr.mxu0 %v3551_v45 }
 0x3a1   :  { %2795 = vmatprep.subr.mxu1 %v3587_v13  ;;  %2753 = vmatpush3.msra.mxu0 %v3551_v45 }
 0x3a2   :  { %2796 = vmatpush3.msra.mxu1 %v3587_v13  ;;  %2754 = vmatprep.subr.mxu0 %v3566_v57 }
 0x3a3   :  { %2797 = vmatprep.subr.mxu1 %v3598_v48  ;;  %2755 = vmatpush3.msra.mxu0 %v3566_v57 }
 0x3a4   :  { %2798 = vmatpush3.msra.mxu1 %v3598_v48  ;;  %2756 = vmatprep.subr.mxu0 %v3581_v6 }
 0x3a5   :  { %2799 = vmatprep.subr.mxu1 %v3612_v3  ;;  %2757 = vmatpush3.msra.mxu0 %v3581_v6 }
 0x3a6   :  { %2800 = vmatpush3.msra.mxu1 %v3612_v3  ;;  %2758 = vmatprep.subr.mxu0 %v3596_v40 }
 0x3a7   :  { %2801 = vmatprep.subr.mxu1 %v3631_v19  ;;  %2759 = vmatpush3.msra.mxu0 %v3596_v40 }
 0x3a8   :  { %2802 = vmatpush3.msra.mxu1 %v3631_v19  ;;  %2760 = vmatprep.subr.mxu0 %v3616_v4 }
 0x3a9   :  { %2803 = vmatprep.subr.mxu1 %v3636_v21  ;;  %2761 = vmatpush3.msra.mxu0 %v3616_v4 }
 0x3aa   :  { %2804 = vmatpush3.msra.mxu1 %v3636_v21  ;;  %2762 = vmatprep.subr.mxu0 %v3626_v16 }
 0x3ab   :  { %2805 = vmatprep.subr.mxu1 %v3660_v61  ;;  %2763 = vmatpush3.msra.mxu0 %v3626_v16 }
 0x3ac   :  { %2806 = vmatpush3.msra.mxu1 %v3660_v61  ;;  %2764 = vmatprep.subr.mxu0 %v3642_v23 }
 0x3ad   :  { %2808 = vmatmul.mubr.f32.vlgmr.msra.gmra.mxu1 %v3690_v25  ;;  %2765 = vmatpush3.msra.mxu0 %v3642_v23 }
 0x3ae   :  { %2766 = vmatprep.subr.mxu0 %v3658_v53 }
 0x3af   :  { %2767 = vmatpush3.msra.mxu0 %v3658_v53 }
 0x3b0   :  { %2768 = vmatprep.subr.mxu0 %v3664_v62 }
 0x3b1   :  { %2769 = vmatpush3.msra.mxu0 %v3664_v62 }
 0x3b2   :  { %2770 = vmatprep.subr.mxu0 %v3677_v63 }
 0x3b3   :  { %2771 = vmatpush3.msra.mxu0 %v3677_v63 }
 0x3b4   :  { %2773 = vmatmul.mubr.f32.vlgmr.msra.gmra.mxu0 %v3690_v25 }
 0x42a   :  { %v2669_v38 = vpop.f32.mrf.mxu1 }
 0x42c   :  { %v1613_v2 = vpop.f32.mrf.mxu1 }
 0x432   :  { %v2634_v32 = vpop.f32.mrf.mxu0 }
 0x433   :  { %v1463_v51 = vadd.f32 %v2634_v32, %v2071_v37 }
 0x434   :  { %v1452_v50 = vpop.f32.mrf.mxu0 }
 0x435   :  { %v1453_v59 = vadd.f32 %v2071_v37, %v1452_v50  ;;  %v1620_v7 = vadd.f32 %v2669_v38, %v1463_v51 }
 0x437   :  { %v1614_v36 = vadd.f32 %v1613_v2, %v1453_v59 }
 0x44b   :  { %v2739_v12 = vpop.f32.mrf.mxu1 }
 0x44d   :  { %v1819_v44 = vpop.f32.mrf.mxu1 }
 0x453   :  { %v2704_v56 = vpop.f32.mrf.mxu0 }
 0x454   :  { %v1731_v35 = vadd.f32 %v2704_v56, %v1620_v7 }
 0x455   :  { %v1723_v18 = vpop.f32.mrf.mxu0 }
 0x456   :  { %v1724_v41 = vadd.f32 %v1723_v18, %v1614_v36  ;;  %v1828_v55 = vadd.f32 %v2739_v12, %v1731_v35 }
 0x458   :  { %v1820_v39 = vadd.f32 %v1819_v44, %v1724_v41 }
 0x46d   :  { %v2809_v14 = vpop.f32.mrf.mxu1 }
 0x46f   :  { %v2039_v47 = vpop.f32.mrf.mxu1 }
 0x474   :  { %v2774_v5 = vpop.f32.mrf.mxu0 }
 0x475   :  { %v1953_v29 = vadd.f32 %v2774_v5, %v1828_v55 }
 0x476   :  { %v1946_v42 = vpop.f32.mrf.mxu0 }
 0x477   :  { %v2046_v45 = vadd.f32 %v2809_v14, %v1953_v29  ;;  %v1947_v46 = vadd.f32 %v1946_v42, %v1820_v39 }
 0x479   :  { %2050 = vst [vmem:[#allocation5 + $0x8] sm:$0xff] %v2046_v45  ;;  %v2040_v57 = vadd.f32 %v2039_v47, %v1947_v46 }
 0x47b   :  { %2049 = vst [vmem:[#allocation5] sm:$0xff] %v2040_v57 }
 0x47c   :  { %2857 = shalt.err (!%p2854_p9)
}
 0x47d   :  { %2062 = dma.vmem_to_hbm [thread:$0]  %s2057_s0, 256, %s3846_s8, [#allocation4], %s2871_s30, %s2871_s30, %s2872_s9  }
 0x47e   :  { %2868 = dma.done.wait [#allocation4], 256  }
 0x47f   :  { %2869 = vsyncadd [#allocation4], 4294967040 }
 0x480   :  { %2066 = vsyncpa [#allocation3], 1 }
 0x481   :  { %2067 = vsyncpa [#allocation4], 1 }

</bundles_post_ra>
